<compile_context>
chip_gen: v7x
topology: tpu7x:2x2x1
jax: 0.10.0
libtpu: 0.0.40
codegen_flags: <defaults>
</compile_context>

<pallas_src>
import math
from functools import partial

import jax
import jax.numpy as jnp
from jax.experimental import pallas as pl
from jax.experimental.pallas import tpu as pltpu

LANE = 128        # lane width: feature dims padded to a multiple of this
SUBLANE_BF16 = 16  # bf16 packing unit along sublanes: batch rounded to this


def _round_up(n, m):
    return ((n + m - 1) // m) * m


def _pad2d(a, rows, cols):
    pr, pc = rows - a.shape[0], cols - a.shape[1]
    return jnp.pad(a, ((0, pr), (0, pc))) if (pr or pc) else a


def mlp_kernel(x_ref, w1_ref, b1_ref, w2_ref, b2_ref, o_ref):
    # bf16 cast of the activations happens in-kernel (x arrives as f32).
    x = x_ref[...].astype(jnp.bfloat16)
    # First Linear: [TB, in_p](bf16) @ [in_p, out_p](bf16) -> f32 acc, + f32 bias.
    h = jnp.dot(x, w1_ref[...], preferred_element_type=jnp.float32)
    h = h + b1_ref[...]
    # Second Linear: re-cast intermediate to bf16 for the MXU, accumulate in f32.
    h = h.astype(jnp.bfloat16)
    y = jnp.dot(h, w2_ref[...], preferred_element_type=jnp.float32)
    y = y + b2_ref[...]
    o_ref[...] = y.astype(o_ref.dtype)
    # TODO(synk): for large feature dims (>= ~2k on v7x's 64 MiB VMEM) add a
    # K-reduction grid axis with tiled weights + f32 VMEM accumulator, and tile
    # the first matmul's N dim with an explicit VMEM scratch for h, instead of
    # keeping both weight matrices resident.


def init_test_model_params(key, in_features, out_features):
    """Deterministic init mimicking torch.nn.Linear default (U(-1/sqrt(fan_in), +))."""
    k1w, k1b, k2w, k2b = jax.random.split(key, 4)
    b1nd = 1.0 / math.sqrt(in_features)
    w1_t = jax.random.uniform(k1w, (in_features, out_features), jnp.float32, -b1nd, b1nd)
    b1 = jax.random.uniform(k1b, (1, out_features), jnp.float32, -b1nd, b1nd)
    b2nd = 1.0 / math.sqrt(out_features)
    w2_t = jax.random.uniform(k2w, (out_features, in_features), jnp.float32, -b2nd, b2nd)
    b2 = jax.random.uniform(k2b, (1, in_features), jnp.float32, -b2nd, b2nd)
    return w1_t, b1, w2_t, b2


def pack_params(w1_t, b1, w2_t, b2):
    """One-time pad to lane-dense shapes + bf16 cast of weights (hoisted out of
    the per-call path). Zero padding keeps the math exact."""
    in_f, out_f = w1_t.shape
    in_p, out_p = _round_up(in_f, LANE), _round_up(out_f, LANE)
    w1_p = _pad2d(w1_t, in_p, out_p).astype(jnp.bfloat16)
    w2_p = _pad2d(w2_t, out_p, in_p).astype(jnp.bfloat16)
    b1_p = _pad2d(b1, 1, out_p).astype(jnp.float32)
    b2_p = _pad2d(b2, 1, in_p).astype(jnp.float32)
    return w1_p, b1_p, w2_p, b2_p


@partial(jax.jit, static_argnames=("single_buffer",))
def test_model_forward(x, w1_p, b1_p, w2_p, b2_p, single_buffer=True):
    """Forward pass. x: [B, in_features] f32. Padded/bf16 params from pack_params."""
    B, in_f = x.shape
    in_p, out_p = w1_p.shape

    # --- batch tiling (multiples of 16 for bf16 sublane packing) -------------
    B_pad = _round_up(max(B, SUBLANE_BF16), SUBLANE_BF16)
    TB = min(256, B_pad)                       # fill the 256x256 MXU on v6e/v7x
    if B_pad // TB < 2 and B_pad >= 2 * SUBLANE_BF16:
        # Split into >=2 tiles so the "parallel" axis can use both v7x TCs.
        TB = _round_up(B_pad // 2, SUBLANE_BF16)
    B_pad = _round_up(B_pad, TB)
    n_tiles = B_pad // TB

    # Only x is padded per call (cheap relative to the weights; fuses under jit).
    x_p = _pad2d(x, B_pad, in_p)

    # --- VMEM budget and cost estimate ---------------------------------------
    wbuf = 1 if single_buffer else 2
    weight_bytes = (in_p * out_p + out_p * in_p) * 2          # bf16
    bias_bytes = (out_p + in_p) * 4
    io_bytes = 2 * (TB * in_p * 4) * 2                        # x + out tiles, double-buffered
    h_bytes = TB * out_p * 4 + TB * max(in_p, out_p) * 2 * 2  # f32 intermediate + bf16 temps
    vmem_limit = weight_bytes * wbuf + bias_bytes * wbuf + io_bytes + h_bytes + (8 << 20)
    vmem_limit = int(max(16 << 20, min(vmem_limit, 64 << 20)))  # stay within v7x physical

    cost = pl.CostEstimate(
        flops=2 * B_pad * (in_p * out_p + out_p * in_p),
        transcendentals=0,
        bytes_accessed=weight_bytes + bias_bytes + B_pad * in_p * 4 * 2,
    )

    def resident_spec(shape):
        # Constant index_map -> weight stays resident; single-buffer it.
        if single_buffer:
            return pl.BlockSpec(shape, lambda i: (0, 0), pipeline_mode=pl.Buffered(1))
        return pl.BlockSpec(shape, lambda i: (0, 0))

    out_padded = pl.pallas_call(
        mlp_kernel,
        out_shape=jax.ShapeDtypeStruct((B_pad, in_p), jnp.float32),
        grid_spec=pltpu.PrefetchScalarGridSpec(
            num_scalar_prefetch=0,
            grid=(n_tiles,),
            in_specs=[
                pl.BlockSpec((TB, in_p), lambda i: (i, 0)),   # x tile (f32)
                resident_spec((in_p, out_p)),                 # W1 (bf16, resident)
                resident_spec((1, out_p)),                    # b1 (f32)
                resident_spec((out_p, in_p)),                 # W2 (bf16, resident)
                resident_spec((1, in_p)),                     # b2 (f32)
            ],
            out_specs=pl.BlockSpec((TB, in_p), lambda i: (i, 0)),
        ),
        compiler_params=pltpu.CompilerParams(
            dimension_semantics=("parallel",),   # batch tiles are independent
            vmem_limit_bytes=vmem_limit,
        ),
        cost_estimate=cost,
    )(x_p, w1_p, b1_p, w2_p, b2_p)

    # Strip padding; under jit this slice fuses with the consumer.
    return out_padded[:B, :in_f]


if __name__ == "__main__":
    in_features = 32
    out_features = 64
    batch = 8

    key = jax.random.PRNGKey(0)
    k_x, k_p = jax.random.split(key)

    x = jax.random.normal(k_x, (batch, in_features), jnp.float32)
    w1_t, b1, w2_t, b2 = init_test_model_params(k_p, in_features, out_features)
    packed = pack_params(w1_t, b1, w2_t, b2)   # one-time pad + bf16 cast

    try:
        out = jax.block_until_ready(test_model_forward(x, *packed, single_buffer=True))
    except Exception:
        # Fallback if this JAX build rejects pipeline_mode=pl.Buffered(1).
        out = jax.block_until_ready(test_model_forward(x, *packed, single_buffer=False))

    assert out.shape == (batch, in_features)

    # Reference 1: bf16-emulated path (matches the kernel's operand precision).
    def emu(a):
        return a.astype(jnp.bfloat16).astype(jnp.float32)

    h_ref = emu(x) @ emu(w1_t) + b1
    ref_bf16 = emu(h_ref) @ emu(w2_t) + b2
    assert jnp.allclose(out, ref_bf16, atol=2e-3, rtol=2e-3)

    # Reference 2: full-f32 reference (loose tolerance: bf16 operand rounding).
    ref_f32 = (x @ w1_t + b1) @ w2_t + b2
    assert jnp.allclose(out, ref_f32, atol=5e-2, rtol=5e-2)

    print("KERNEL_OK")
</pallas_src>

<mosaic_0001>
module attributes {stable_mosaic.version = 11 : i64} {
  func.func @mlp_kernel(%arg0: i32, %arg1: memref<16x128xf32, #tpu.memory_space<vmem>>, %arg2: memref<128x128xbf16, #tpu.memory_space<vmem>>, %arg3: memref<1x128xf32, #tpu.memory_space<vmem>>, %arg4: memref<128x128xbf16, #tpu.memory_space<vmem>>, %arg5: memref<1x128xf32, #tpu.memory_space<vmem>>, %arg6: memref<16x128xf32, #tpu.memory_space<vmem>>) attributes {dimension_semantics = [#tpu.dimension_semantics<parallel>], iteration_bounds = array<i64: 1>, scalar_prefetch = 0 : i64, scratch_operands = 0 : i64, tpu.core_type = #tpu.core_type<tc>, window_params = [{transform_indices = @transform_0, window_bounds = array<i64: 16, 128>}, {pipeline_mode = #tpu.pipeline_mode<synchronous>, transform_indices = @transform_1, window_bounds = array<i64: 128, 128>}, {pipeline_mode = #tpu.pipeline_mode<synchronous>, transform_indices = @transform_2, window_bounds = array<i64: 1, 128>}, {pipeline_mode = #tpu.pipeline_mode<synchronous>, transform_indices = @transform_3, window_bounds = array<i64: 128, 128>}, {pipeline_mode = #tpu.pipeline_mode<synchronous>, transform_indices = @transform_4, window_bounds = array<i64: 1, 128>}, {transform_indices = @transform_5, window_bounds = array<i64: 16, 128>}]} {
    %c0 = arith.constant 0 : index
    %c0_0 = arith.constant 0 : index
    %0 = vector.load %arg1[%c0, %c0_0] : memref<16x128xf32, #tpu.memory_space<vmem>>, vector<16x128xf32>
    %1 = arith.truncf %0 : vector<16x128xf32> to vector<16x128xbf16>
    %c0_1 = arith.constant 0 : index
    %c0_2 = arith.constant 0 : index
    %2 = vector.load %arg2[%c0_1, %c0_2] : memref<128x128xbf16, #tpu.memory_space<vmem>>, vector<128x128xbf16>
    %cst = arith.constant dense<0.000000e+00> : vector<16x128xf32>
    %3 = tpu.matmul %1, %2, %cst {dimension_numbers = #tpu.dot_dimension_numbers<[1], [0], [0], [1], [0, 0, 1, 1], [], []>} : vector<16x128xbf16>, vector<128x128xbf16>, vector<16x128xf32> -> vector<16x128xf32>
    %c0_3 = arith.constant 0 : index
    %c0_4 = arith.constant 0 : index
    %4 = vector.load %arg3[%c0_3, %c0_4] : memref<1x128xf32, #tpu.memory_space<vmem>>, vector<1x128xf32>
    %5 = vector.broadcast %4 : vector<1x128xf32> to vector<16x128xf32>
    %6 = arith.addf %3, %5 : vector<16x128xf32>
    %7 = arith.truncf %6 : vector<16x128xf32> to vector<16x128xbf16>
    %c0_5 = arith.constant 0 : index
    %c0_6 = arith.constant 0 : index
    %8 = vector.load %arg4[%c0_5, %c0_6] : memref<128x128xbf16, #tpu.memory_space<vmem>>, vector<128x128xbf16>
    %cst_7 = arith.constant dense<0.000000e+00> : vector<16x128xf32>
    %9 = tpu.matmul %7, %8, %cst_7 {dimension_numbers = #tpu.dot_dimension_numbers<[1], [0], [0], [1], [0, 0, 1, 1], [], []>} : vector<16x128xbf16>, vector<128x128xbf16>, vector<16x128xf32> -> vector<16x128xf32>
    %c0_8 = arith.constant 0 : index
    %c0_9 = arith.constant 0 : index
    %10 = vector.load %arg5[%c0_8, %c0_9] : memref<1x128xf32, #tpu.memory_space<vmem>>, vector<1x128xf32>
    %11 = vector.broadcast %10 : vector<1x128xf32> to vector<16x128xf32>
    %12 = arith.addf %9, %11 : vector<16x128xf32>
    %c0_10 = arith.constant 0 : index
    %c0_11 = arith.constant 0 : index
    %13 = vector.load %arg6[%c0_10, %c0_11] : memref<16x128xf32, #tpu.memory_space<vmem>>, vector<16x128xf32>
    tpu.vector_store %arg6[%c0_10, %c0_11], %12 {strides = array<i32>} : memref<16x128xf32, #tpu.memory_space<vmem>>, vector<16x128xf32>,
    return
  }
  func.func @transform_0(%arg0: i32) -> (i32, i32) {
    %c0_i32 = arith.constant 0 : i32
    %c0_i32_0 = arith.constant 0 : i32
    return %arg0, %c0_i32 : i32, i32
  }
  func.func @transform_1(%arg0: i32) -> (i32, i32) {
    %c0_i32 = arith.constant 0 : i32
    %c0_i32_0 = arith.constant 0 : i32
    %c0_i32_1 = arith.constant 0 : i32
    return %c0_i32, %c0_i32_0 : i32, i32
  }
  func.func @transform_2(%arg0: i32) -> (i32, i32) {
    %c0_i32 = arith.constant 0 : i32
    %c0_i32_0 = arith.constant 0 : i32
    %c0_i32_1 = arith.constant 0 : i32
    return %c0_i32, %c0_i32_0 : i32, i32
  }
  func.func @transform_3(%arg0: i32) -> (i32, i32) {
    %c0_i32 = arith.constant 0 : i32
    %c0_i32_0 = arith.constant 0 : i32
    %c0_i32_1 = arith.constant 0 : i32
    return %c0_i32, %c0_i32_0 : i32, i32
  }
  func.func @transform_4(%arg0: i32) -> (i32, i32) {
    %c0_i32 = arith.constant 0 : i32
    %c0_i32_0 = arith.constant 0 : i32
    %c0_i32_1 = arith.constant 0 : i32
    return %c0_i32, %c0_i32_0 : i32, i32
  }
  func.func @transform_5(%arg0: i32) -> (i32, i32) {
    %c0_i32 = arith.constant 0 : i32
    %c0_i32_0 = arith.constant 0 : i32
    return %arg0, %c0_i32 : i32, i32
  }
}

module attributes {stable_mosaic.version = 11 : i64} {
  func.func @mlp_kernel(%arg0: i32, %arg1: memref<16x128xf32, #tpu.memory_space<vmem>>, %arg2: memref<128x128xbf16, #tpu.memory_space<vmem>>, %arg3: memref<1x128xf32, #tpu.memory_space<vmem>>, %arg4: memref<128x128xbf16, #tpu.memory_space<vmem>>, %arg5: memref<1x128xf32, #tpu.memory_space<vmem>>, %arg6: memref<16x128xf32, #tpu.memory_space<vmem>>) attributes {dimension_semantics = [#tpu.dimension_semantics<parallel>], iteration_bounds = array<i64: 1>, scalar_prefetch = 0 : i64, scratch_operands = 0 : i64, tpu.core_type = #tpu.core_type<tc>, window_params = [{transform_indices = @transform_0, window_bounds = array<i64: 16, 128>}, {pipeline_mode = #tpu.pipeline_mode<synchronous>, transform_indices = @transform_1, window_bounds = array<i64: 128, 128>}, {pipeline_mode = #tpu.pipeline_mode<synchronous>, transform_indices = @transform_2, window_bounds = array<i64: 1, 128>}, {pipeline_mode = #tpu.pipeline_mode<synchronous>, transform_indices = @transform_3, window_bounds = array<i64: 128, 128>}, {pipeline_mode = #tpu.pipeline_mode<synchronous>, transform_indices = @transform_4, window_bounds = array<i64: 1, 128>}, {transform_indices = @transform_5, window_bounds = array<i64: 16, 128>}]} {
    %c0 = arith.constant 0 : index
    %c0_0 = arith.constant 0 : index
    %0 = vector.load %arg1[%c0, %c0_0] : memref<16x128xf32, #tpu.memory_space<vmem>>, vector<16x128xf32>
    %1 = arith.truncf %0 : vector<16x128xf32> to vector<16x128xbf16>
    %c0_1 = arith.constant 0 : index
    %c0_2 = arith.constant 0 : index
    %2 = vector.load %arg2[%c0_1, %c0_2] : memref<128x128xbf16, #tpu.memory_space<vmem>>, vector<128x128xbf16>
    %cst = arith.constant dense<0.000000e+00> : vector<16x128xf32>
    %3 = tpu.matmul %1, %2, %cst {dimension_numbers = #tpu.dot_dimension_numbers<[1], [0], [0], [1], [0, 0, 1, 1], [], []>} : vector<16x128xbf16>, vector<128x128xbf16>, vector<16x128xf32> -> vector<16x128xf32>
    %c0_3 = arith.constant 0 : index
    %c0_4 = arith.constant 0 : index
    %4 = vector.load %arg3[%c0_3, %c0_4] : memref<1x128xf32, #tpu.memory_space<vmem>>, vector<1x128xf32>
    %5 = vector.broadcast %4 : vector<1x128xf32> to vector<16x128xf32>
    %6 = arith.addf %3, %5 : vector<16x128xf32>
    %7 = arith.truncf %6 : vector<16x128xf32> to vector<16x128xbf16>
    %c0_5 = arith.constant 0 : index
    %c0_6 = arith.constant 0 : index
    %8 = vector.load %arg4[%c0_5, %c0_6] : memref<128x128xbf16, #tpu.memory_space<vmem>>, vector<128x128xbf16>
    %cst_7 = arith.constant dense<0.000000e+00> : vector<16x128xf32>
    %9 = tpu.matmul %7, %8, %cst_7 {dimension_numbers = #tpu.dot_dimension_numbers<[1], [0], [0], [1], [0, 0, 1, 1], [], []>} : vector<16x128xbf16>, vector<128x128xbf16>, vector<16x128xf32> -> vector<16x128xf32>
    %c0_8 = arith.constant 0 : index
    %c0_9 = arith.constant 0 : index
    %10 = vector.load %arg5[%c0_8, %c0_9] : memref<1x128xf32, #tpu.memory_space<vmem>>, vector<1x128xf32>
    %11 = vector.broadcast %10 : vector<1x128xf32> to vector<16x128xf32>
    %12 = arith.addf %9, %11 : vector<16x128xf32>
    %c0_10 = arith.constant 0 : index
    %c0_11 = arith.constant 0 : index
    %13 = vector.load %arg6[%c0_10, %c0_11] : memref<16x128xf32, #tpu.memory_space<vmem>>, vector<16x128xf32>
    tpu.vector_store %arg6[%c0_10, %c0_11], %12 {strides = array<i32>} : memref<16x128xf32, #tpu.memory_space<vmem>>, vector<16x128xf32>,
    return
  }
  func.func @transform_0(%arg0: i32) -> (i32, i32) {
    %c0_i32 = arith.constant 0 : i32
    %c0_i32_0 = arith.constant 0 : i32
    return %arg0, %c0_i32 : i32, i32
  }
  func.func @transform_1(%arg0: i32) -> (i32, i32) {
    %c0_i32 = arith.constant 0 : i32
    %c0_i32_0 = arith.constant 0 : i32
    %c0_i32_1 = arith.constant 0 : i32
    return %c0_i32, %c0_i32_0 : i32, i32
  }
  func.func @transform_2(%arg0: i32) -> (i32, i32) {
    %c0_i32 = arith.constant 0 : i32
    %c0_i32_0 = arith.constant 0 : i32
    %c0_i32_1 = arith.constant 0 : i32
    return %c0_i32, %c0_i32_0 : i32, i32
  }
  func.func @transform_3(%arg0: i32) -> (i32, i32) {
    %c0_i32 = arith.constant 0 : i32
    %c0_i32_0 = arith.constant 0 : i32
    %c0_i32_1 = arith.constant 0 : i32
    return %c0_i32, %c0_i32_0 : i32, i32
  }
  func.func @transform_4(%arg0: i32) -> (i32, i32) {
    %c0_i32 = arith.constant 0 : i32
    %c0_i32_0 = arith.constant 0 : i32
    %c0_i32_1 = arith.constant 0 : i32
    return %c0_i32, %c0_i32_0 : i32, i32
  }
  func.func @transform_5(%arg0: i32) -> (i32, i32) {
    %c0_i32 = arith.constant 0 : i32
    %c0_i32_0 = arith.constant 0 : i32
    return %arg0, %c0_i32 : i32, i32
  }
}

</mosaic_0001>

<bundles_post_ra>
// kernel: test_model_forward.1
= control target key start
LH: loop header
LB: loop body
LE: loop exit
PB: predicated region body
PF: predicated region fallthrough
CT: control target
= control target key end

     0   :  { %10 = vsyncpa [#allocation3], 0  ;;  %s509_s0 = inlined_call_operand.vmem [shape: f32[16,128], index: 0, kind: input, shape index: {}]   ;;  %s510_s1 = inlined_call_operand.hbm [shape: bf16[128,128], index: 1, kind: input, shape index: {}]   ;;  %s511_s2 = inlined_call_operand.vmem [shape: f32[1,128], index: 2, kind: input, shape index: {}]   ;;  %s512_s3 = inlined_call_operand.hbm [shape: bf16[128,128], index: 3, kind: input, shape index: {}]   ;;  %s513_s4 = inlined_call_operand.vmem [shape: f32[1,128], index: 4, kind: input, shape index: {}]   ;;  %s514_s5 = inlined_call_operand.vmem [shape: f32[16,128], index: 5, kind: output, shape index: {}]  }
   0x1   :  { %11 = vsyncpa [#allocation5], 0  ;;  %s431_s18 = smov [#allocation2]   ;;  %s383_s22 = scalar_lea.hbm %s510_s1, 1024 }
   0x2   :  { %s19_s19 = sshll.u32 %s431_s18, 4  ;;  %p384_p0 = scmp.ne.s32.totalorder %s510_s1, %s383_s22  ;;  %s20_s19 = int_to_ptr.vmem [resolvable:$true] %s19_s19 }
   0x3   :  { %p387_p1 = scmp.lt.u32.totalorder %s383_s22, %s510_s1 }
   0x5   :  { %p389_p2 = pnand %p387_p1, %p384_p0 }
   0x7   :  { %392 = shalt.err (!%p389_p2)
}
   0x8   :  { %s393_s27 = scalar_lea.vmem %s20_s19, 1024  ;;  %p398_p4 = scmp.lt.s32.totalorder %s20_s19, %s20_s19 }
   0x9   :  { %p394_p3 = scmp.ne.s32.totalorder %s20_s19, %s393_s27  ;;  %p399_p5 = scmp.lt.s32.totalorder %s393_s27, %s393_s27 }
   0xb   :  { %p400_p6 = por %p399_p5, %p398_p4 }
   0xd   :  { %p401_p7 = pnand %p400_p6, %p394_p3 }
   0xf   :  { %404 = shalt.err (!%p401_p7)
}
  0x10   :  { %s432_s28 = smov 64   ;;  %s433_s29 = smov 4  }
  0x11   :  { %25 = dma.hbm_to_vmem [thread:$0]  %s510_s1, 1024, %s20_s19, [#allocation3], %s432_s28, %s432_s28, %s433_s29  }
  0x12   :  { %s434_s7 = smov [#allocation4]   ;;  %s405_s11 = scalar_lea.hbm %s512_s3, 1024 }
  0x13   :  { %s33_s8 = sshll.u32 %s434_s7, 4  ;;  %p406_p8 = scmp.ne.s32.totalorder %s512_s3, %s405_s11  ;;  %s34_s8 = int_to_ptr.vmem [resolvable:$true] %s33_s8 }
  0x14   :  { %p409_p9 = scmp.lt.u32.totalorder %s405_s11, %s512_s3 }
  0x16   :  { %p411_p10 = pnand %p409_p9, %p406_p8 }
  0x18   :  { %414 = shalt.err (!%p411_p10)
}
  0x19   :  { %s415_s16 = scalar_lea.vmem %s34_s8, 1024  ;;  %p420_p12 = scmp.lt.s32.totalorder %s34_s8, %s34_s8 }
  0x1a   :  { %p416_p11 = scmp.ne.s32.totalorder %s34_s8, %s415_s16  ;;  %p421_p13 = scmp.lt.s32.totalorder %s415_s16, %s415_s16 }
  0x1c   :  { %p422_p0 = por %p421_p13, %p420_p12 }
  0x1e   :  { %p423_p1 = pnand %p422_p0, %p416_p11 }
  0x20   :  { %426 = shalt.err (!%p423_p1)
}
  0x21   :  { %39 = dma.hbm_to_vmem [thread:$0]  %s512_s3, 1024, %s34_s8, [#allocation5], %s432_s28, %s432_s28, %s433_s29  }
  0x22   :  { %427 = dma.done.wait [#allocation3], 1024  }
  0x23   :  { %428 = vsyncadd [#allocation3], 4294966272 }
  0x24   :  { %429 = dma.done.wait [#allocation5], 1024  }
  0x25   :  { %430 = vsyncadd [#allocation5], 4294966272  ;;  %v435_v0 = vmov 0.0   ;;  %vm436_vm0 = vmmov 0   ;;  %v367_v1 = vld [vmem:[#allocation2] sm:$0xff]   ;;  %v368_v2 = vld [vmem:[#allocation2 + $0x8] sm:$0xff]  }
  0x26   :  { %321 = vmatprep.subr.bf16.mxu0 %v435_v0  ;;  %337 = vmatprep.mubr.msk.bf16.mxu0 %vm436_vm0, %v435_v0  ;;  %v369_v3 = vld [vmem:[#allocation2 + $0x10] sm:$0xff]   ;;  %v375_v4 = vld [vmem:[#allocation4] sm:$0xff]   ;;  %v370_v5 = vld [vmem:[#allocation2 + $0x18] sm:$0xff]  }
  0x27   :  { %341 = vmatprep.subr.bf16.mxu1 %v435_v0  ;;  %357 = vmatprep.mubr.msk.bf16.mxu1 %vm436_vm0, %v435_v0  ;;  %v376_v6 = vld [vmem:[#allocation4 + $0x8] sm:$0xff]   ;;  %v371_v7 = vld [vmem:[#allocation2 + $0x20] sm:$0xff]   ;;  %v377_v8 = vld [vmem:[#allocation4 + $0x10] sm:$0xff]  }
  0x28   :  { %322 = vmatpush3.bf16.msra.mxu0 %v367_v1  ;;  %342 = vmatpush3.bf16.msra.mxu1 %v375_v4  ;;  %v372_v9 = vld [vmem:[#allocation2 + $0x28] sm:$0xff]   ;;  %v378_v10 = vld [vmem:[#allocation4 + $0x18] sm:$0xff]   ;;  %v373_v11 = vld [vmem:[#allocation2 + $0x30] sm:$0xff]  }
  0x29   :  { %323 = vmatprep.subr.bf16.mxu0 %v435_v0  ;;  %343 = vmatprep.subr.bf16.mxu1 %v435_v0  ;;  %v379_v12 = vld [vmem:[#allocation4 + $0x20] sm:$0xff]   ;;  %v374_v13 = vld [vmem:[#allocation2 + $0x38] sm:$0xff]   ;;  %v50_v15 = vld [vmem:[%s509_s0 + $0x8] sm:$0xff] }
  0x2a   :  { %v49_v14 = vld [vmem:[%s509_s0] sm:$0xff]  ;;  %v380_v16 = vld [vmem:[#allocation4 + $0x28] sm:$0xff]   ;;  %v381_v18 = vld [vmem:[#allocation4 + $0x30] sm:$0xff]  }
  0x2b   :  { %v51_v17 = vpack.c.bf16 %v50_v15, %v49_v14  ;;  %v382_v19 = vld [vmem:[#allocation4 + $0x38] sm:$0xff]   ;;  %v285_v20 = vld [vmem:[%s511_s2] ss:$0 sm:$0xff] }
  0x2c   :  { %324 = vmatpush3.bf16.msra.mxu0 %v368_v2  ;;  %344 = vmatpush3.bf16.msra.mxu1 %v376_v6  ;;  %v294_v28 = vld [vmem:[%s513_s4] ss:$0 sm:$0xff] }
  0x2d   :  { %325 = vmatprep.subr.bf16.mxu0 %v435_v0  ;;  %345 = vmatprep.subr.bf16.mxu1 %v435_v0 }
  0x30   :  { %326 = vmatpush3.bf16.msra.mxu0 %v369_v3  ;;  %346 = vmatpush3.bf16.msra.mxu1 %v377_v8 }
  0x31   :  { %327 = vmatprep.subr.bf16.mxu0 %v435_v0  ;;  %347 = vmatprep.subr.bf16.mxu1 %v435_v0 }
  0x34   :  { %328 = vmatpush3.bf16.msra.mxu0 %v370_v5  ;;  %348 = vmatpush3.bf16.msra.mxu1 %v378_v10 }
  0x35   :  { %329 = vmatprep.subr.bf16.mxu0 %v435_v0  ;;  %349 = vmatprep.subr.bf16.mxu1 %v435_v0 }
  0x38   :  { %330 = vmatpush3.bf16.msra.mxu0 %v371_v7  ;;  %350 = vmatpush3.bf16.msra.mxu1 %v379_v12 }
  0x39   :  { %331 = vmatprep.subr.bf16.mxu0 %v435_v0  ;;  %351 = vmatprep.subr.bf16.mxu1 %v435_v0 }
  0x3c   :  { %332 = vmatpush3.bf16.msra.mxu0 %v372_v9  ;;  %352 = vmatpush3.bf16.msra.mxu1 %v380_v16 }
  0x3d   :  { %333 = vmatprep.subr.bf16.mxu0 %v435_v0  ;;  %353 = vmatprep.subr.bf16.mxu1 %v435_v0 }
  0x40   :  { %334 = vmatpush3.bf16.msra.mxu0 %v373_v11  ;;  %354 = vmatpush3.bf16.msra.mxu1 %v381_v18 }
  0x41   :  { %335 = vmatprep.subr.bf16.mxu0 %v435_v0  ;;  %355 = vmatprep.subr.bf16.mxu1 %v435_v0 }
  0x44   :  { %336 = vmatpush3.bf16.msra.mxu0 %v374_v13  ;;  %356 = vmatpush3.bf16.msra.mxu1 %v382_v19 }
  0x47   :  { %338 = vmatmul.mubr.bf16.vlgmr.msra.gmra.mrb[0].mxu0 %v51_v17 }
 0x11a   :  { %v157_v21 = vpop.f32.mrb[0].mxu0 }
 0x11b   :  { %v339_v22 = vpop.f32.mrb[1].mxu0  ;;  %v158_v24 = vadd.f32 %v285_v20, %v157_v21 }
 0x11c   :  { %v160_v23 = vpop.f32.mrb[2].mxu0 }
 0x11d   :  { %v161_v25 = vadd.f32 %v285_v20, %v160_v23  ;;  %v340_v26 = vpop.f32.mrb[3].mxu0 }
 0x11f   :  { %v164_v27 = vpack.c.bf16 %v161_v25, %v158_v24 }
 0x121   :  { %358 = vmatmul.mubr.bf16.vlgmr.msra.gmra.mrb[0].mxu1 %v164_v27 }
 0x1f4   :  { %v270_v29 = vpop.f32.mrb[0].mxu1 }
 0x1f5   :  { %v271_v30 = vadd.f32 %v294_v28, %v270_v29  ;;  %v359_v31 = vpop.f32.mrb[1].mxu1 }
 0x1f6   :  { %v273_v32 = vpop.f32.mrb[2].mxu1 }
 0x1f7   :  { %277 = vst [vmem:[%s514_s5] sm:$0xff] %v271_v30  ;;  %v274_v33 = vadd.f32 %v294_v28, %v273_v32  ;;  %v360_v34 = vpop.f32.mrb[3].mxu1 }
 0x1f9   :  { %278 = vst [vmem:[%s514_s5 + $0x8] sm:$0xff] %v274_v33 }
 0x1fa   :  { %283 = vsyncpa [#allocation3], 1 }
 0x1fb   :  { %284 = vsyncpa [#allocation5], 1 }

// kernel: test_model_forward.1
= control target key start
LH: loop header
LB: loop body
LE: loop exit
PB: predicated region body
PF: predicated region fallthrough
CT: control target
= control target key end

     0   :  { %10 = vsyncpa [#allocation3], 0  ;;  %s509_s0 = inlined_call_operand.vmem [shape: f32[16,128], index: 0, kind: input, shape index: {}]   ;;  %s510_s1 = inlined_call_operand.hbm [shape: bf16[128,128], index: 1, kind: input, shape index: {}]   ;;  %s511_s2 = inlined_call_operand.vmem [shape: f32[1,128], index: 2, kind: input, shape index: {}]   ;;  %s512_s3 = inlined_call_operand.hbm [shape: bf16[128,128], index: 3, kind: input, shape index: {}]   ;;  %s513_s4 = inlined_call_operand.vmem [shape: f32[1,128], index: 4, kind: input, shape index: {}]   ;;  %s514_s5 = inlined_call_operand.vmem [shape: f32[16,128], index: 5, kind: output, shape index: {}]  }
   0x1   :  { %11 = vsyncpa [#allocation5], 0  ;;  %s431_s18 = smov [#allocation2]   ;;  %s383_s22 = scalar_lea.hbm %s510_s1, 1024 }
   0x2   :  { %s19_s19 = sshll.u32 %s431_s18, 4  ;;  %p384_p0 = scmp.ne.s32.totalorder %s510_s1, %s383_s22  ;;  %s20_s19 = int_to_ptr.vmem [resolvable:$true] %s19_s19 }
   0x3   :  { %p387_p1 = scmp.lt.u32.totalorder %s383_s22, %s510_s1 }
   0x5   :  { %p389_p2 = pnand %p387_p1, %p384_p0 }
   0x7   :  { %392 = shalt.err (!%p389_p2)
}
   0x8   :  { %s393_s27 = scalar_lea.vmem %s20_s19, 1024  ;;  %p398_p4 = scmp.lt.s32.totalorder %s20_s19, %s20_s19 }
   0x9   :  { %p394_p3 = scmp.ne.s32.totalorder %s20_s19, %s393_s27  ;;  %p399_p5 = scmp.lt.s32.totalorder %s393_s27, %s393_s27 }
   0xb   :  { %p400_p6 = por %p399_p5, %p398_p4 }
   0xd   :  { %p401_p7 = pnand %p400_p6, %p394_p3 }
   0xf   :  { %404 = shalt.err (!%p401_p7)
}
  0x10   :  { %s432_s28 = smov 64   ;;  %s433_s29 = smov 4  }
  0x11   :  { %25 = dma.hbm_to_vmem [thread:$0]  %s510_s1, 1024, %s20_s19, [#allocation3], %s432_s28, %s432_s28, %s433_s29  }
  0x12   :  { %s434_s7 = smov [#allocation4]   ;;  %s405_s11 = scalar_lea.hbm %s512_s3, 1024 }
  0x13   :  { %s33_s8 = sshll.u32 %s434_s7, 4  ;;  %p406_p8 = scmp.ne.s32.totalorder %s512_s3, %s405_s11  ;;  %s34_s8 = int_to_ptr.vmem [resolvable:$true] %s33_s8 }
  0x14   :  { %p409_p9 = scmp.lt.u32.totalorder %s405_s11, %s512_s3 }
  0x16   :  { %p411_p10 = pnand %p409_p9, %p406_p8 }
  0x18   :  { %414 = shalt.err (!%p411_p10)
}
  0x19   :  { %s415_s16 = scalar_lea.vmem %s34_s8, 1024  ;;  %p420_p12 = scmp.lt.s32.totalorder %s34_s8, %s34_s8 }
  0x1a   :  { %p416_p11 = scmp.ne.s32.totalorder %s34_s8, %s415_s16  ;;  %p421_p13 = scmp.lt.s32.totalorder %s415_s16, %s415_s16 }
  0x1c   :  { %p422_p0 = por %p421_p13, %p420_p12 }
  0x1e   :  { %p423_p1 = pnand %p422_p0, %p416_p11 }
  0x20   :  { %426 = shalt.err (!%p423_p1)
}
  0x21   :  { %39 = dma.hbm_to_vmem [thread:$0]  %s512_s3, 1024, %s34_s8, [#allocation5], %s432_s28, %s432_s28, %s433_s29  }
  0x22   :  { %427 = dma.done.wait [#allocation3], 1024  }
  0x23   :  { %428 = vsyncadd [#allocation3], 4294966272 }
  0x24   :  { %429 = dma.done.wait [#allocation5], 1024  }
  0x25   :  { %430 = vsyncadd [#allocation5], 4294966272  ;;  %v435_v0 = vmov 0.0   ;;  %vm436_vm0 = vmmov 0   ;;  %v367_v1 = vld [vmem:[#allocation2] sm:$0xff]   ;;  %v368_v2 = vld [vmem:[#allocation2 + $0x8] sm:$0xff]  }
  0x26   :  { %321 = vmatprep.subr.bf16.mxu0 %v435_v0  ;;  %337 = vmatprep.mubr.msk.bf16.mxu0 %vm436_vm0, %v435_v0  ;;  %v369_v3 = vld [vmem:[#allocation2 + $0x10] sm:$0xff]   ;;  %v375_v4 = vld [vmem:[#allocation4] sm:$0xff]   ;;  %v370_v5 = vld [vmem:[#allocation2 + $0x18] sm:$0xff]  }
  0x27   :  { %341 = vmatprep.subr.bf16.mxu1 %v435_v0  ;;  %357 = vmatprep.mubr.msk.bf16.mxu1 %vm436_vm0, %v435_v0  ;;  %v376_v6 = vld [vmem:[#allocation4 + $0x8] sm:$0xff]   ;;  %v371_v7 = vld [vmem:[#allocation2 + $0x20] sm:$0xff]   ;;  %v377_v8 = vld [vmem:[#allocation4 + $0x10] sm:$0xff]  }
  0x28   :  { %322 = vmatpush3.bf16.msra.mxu0 %v367_v1  ;;  %342 = vmatpush3.bf16.msra.mxu1 %v375_v4  ;;  %v372_v9 = vld [vmem:[#allocation2 + $0x28] sm:$0xff]   ;;  %v378_v10 = vld [vmem:[#allocation4 + $0x18] sm:$0xff]   ;;  %v373_v11 = vld [vmem:[#allocation2 + $0x30] sm:$0xff]  }
  0x29   :  { %323 = vmatprep.subr.bf16.mxu0 %v435_v0  ;;  %343 = vmatprep.subr.bf16.mxu1 %v435_v0  ;;  %v379_v12 = vld [vmem:[#allocation4 + $0x20] sm:$0xff]   ;;  %v374_v13 = vld [vmem:[#allocation2 + $0x38] sm:$0xff]   ;;  %v50_v15 = vld [vmem:[%s509_s0 + $0x8] sm:$0xff] }
  0x2a   :  { %v49_v14 = vld [vmem:[%s509_s0] sm:$0xff]  ;;  %v380_v16 = vld [vmem:[#allocation4 + $0x28] sm:$0xff]   ;;  %v381_v18 = vld [vmem:[#allocation4 + $0x30] sm:$0xff]  }
  0x2b   :  { %v51_v17 = vpack.c.bf16 %v50_v15, %v49_v14  ;;  %v382_v19 = vld [vmem:[#allocation4 + $0x38] sm:$0xff]   ;;  %v285_v20 = vld [vmem:[%s511_s2] ss:$0 sm:$0xff] }
  0x2c   :  { %324 = vmatpush3.bf16.msra.mxu0 %v368_v2  ;;  %344 = vmatpush3.bf16.msra.mxu1 %v376_v6  ;;  %v294_v28 = vld [vmem:[%s513_s4] ss:$0 sm:$0xff] }
  0x2d   :  { %325 = vmatprep.subr.bf16.mxu0 %v435_v0  ;;  %345 = vmatprep.subr.bf16.mxu1 %v435_v0 }
  0x30   :  { %326 = vmatpush3.bf16.msra.mxu0 %v369_v3  ;;  %346 = vmatpush3.bf16.msra.mxu1 %v377_v8 }
  0x31   :  { %327 = vmatprep.subr.bf16.mxu0 %v435_v0  ;;  %347 = vmatprep.subr.bf16.mxu1 %v435_v0 }
  0x34   :  { %328 = vmatpush3.bf16.msra.mxu0 %v370_v5  ;;  %348 = vmatpush3.bf16.msra.mxu1 %v378_v10 }
  0x35   :  { %329 = vmatprep.subr.bf16.mxu0 %v435_v0  ;;  %349 = vmatprep.subr.bf16.mxu1 %v435_v0 }
  0x38   :  { %330 = vmatpush3.bf16.msra.mxu0 %v371_v7  ;;  %350 = vmatpush3.bf16.msra.mxu1 %v379_v12 }
  0x39   :  { %331 = vmatprep.subr.bf16.mxu0 %v435_v0  ;;  %351 = vmatprep.subr.bf16.mxu1 %v435_v0 }
  0x3c   :  { %332 = vmatpush3.bf16.msra.mxu0 %v372_v9  ;;  %352 = vmatpush3.bf16.msra.mxu1 %v380_v16 }
  0x3d   :  { %333 = vmatprep.subr.bf16.mxu0 %v435_v0  ;;  %353 = vmatprep.subr.bf16.mxu1 %v435_v0 }
  0x40   :  { %334 = vmatpush3.bf16.msra.mxu0 %v373_v11  ;;  %354 = vmatpush3.bf16.msra.mxu1 %v381_v18 }
  0x41   :  { %335 = vmatprep.subr.bf16.mxu0 %v435_v0  ;;  %355 = vmatprep.subr.bf16.mxu1 %v435_v0 }
  0x44   :  { %336 = vmatpush3.bf16.msra.mxu0 %v374_v13  ;;  %356 = vmatpush3.bf16.msra.mxu1 %v382_v19 }
  0x47   :  { %338 = vmatmul.mubr.bf16.vlgmr.msra.gmra.mrb[0].mxu0 %v51_v17 }
 0x11a   :  { %v157_v21 = vpop.f32.mrb[0].mxu0 }
 0x11b   :  { %v339_v22 = vpop.f32.mrb[1].mxu0  ;;  %v158_v24 = vadd.f32 %v285_v20, %v157_v21 }
 0x11c   :  { %v160_v23 = vpop.f32.mrb[2].mxu0 }
 0x11d   :  { %v161_v25 = vadd.f32 %v285_v20, %v160_v23  ;;  %v340_v26 = vpop.f32.mrb[3].mxu0 }
 0x11f   :  { %v164_v27 = vpack.c.bf16 %v161_v25, %v158_v24 }
 0x121   :  { %358 = vmatmul.mubr.bf16.vlgmr.msra.gmra.mrb[0].mxu1 %v164_v27 }
 0x1f4   :  { %v270_v29 = vpop.f32.mrb[0].mxu1 }
 0x1f5   :  { %v271_v30 = vadd.f32 %v294_v28, %v270_v29  ;;  %v359_v31 = vpop.f32.mrb[1].mxu1 }
 0x1f6   :  { %v273_v32 = vpop.f32.mrb[2].mxu1 }
 0x1f7   :  { %277 = vst [vmem:[%s514_s5] sm:$0xff] %v271_v30  ;;  %v274_v33 = vadd.f32 %v294_v28, %v273_v32  ;;  %v360_v34 = vpop.f32.mrb[3].mxu1 }
 0x1f9   :  { %278 = vst [vmem:[%s514_s5 + $0x8] sm:$0xff] %v274_v33 }
 0x1fa   :  { %283 = vsyncpa [#allocation3], 1 }
 0x1fb   :  { %284 = vsyncpa [#allocation5], 1 }

</bundles_post_ra>
